<compile_context>
chip_gen: v6e
topology: v6e:2x2x1
jax: 0.10.0
libtpu: 0.0.40
codegen_flags: <defaults>
</compile_context>

<pallas_src>
import jax
import jax.numpy as jnp
from jax.experimental import pallas as pl
from jax.experimental.pallas import tpu as pltpu

LANES = 128
SUBLANES = 8


def _round_up(x, m):
    return ((x + m - 1) // m) * m


def _vmem_capacity_bytes():
    try:
        return int(pltpu.get_tpu_info().vmem_capacity_bytes)
    except Exception:
        return 64 * 1024 * 1024  # conservative fallback: v7x per-TensorCore VMEM


def _resident_spec(block_shape):
    """Spec for a grid-invariant operand; single-buffered when supported."""
    index_map = lambda i, _n=len(block_shape): (0,) * _n
    try:
        return pl.BlockSpec(block_shape, index_map, pipeline_mode=pl.Buffered(1))
    except Exception:
        return pl.BlockSpec(block_shape, index_map)


def _gating_kernel(x_ref, w_ref, b_ref, o_ref):
    # x_ref: (tm, d_model) bf16   w_ref: (d_model, e_pad) bf16
    # b_ref: (1, e_pad) f32       o_ref: (tm, e_pad) out dtype
    logits = jnp.dot(
        x_ref[...], w_ref[...], preferred_element_type=jnp.float32
    ) + b_ref[...]
    # Padded expert columns carry a -1e30 bias -> exp() underflows to 0, so the
    # softmax over the padded 128-lane tile equals the softmax over the real experts.
    m = jnp.max(logits, axis=-1, keepdims=True)
    e = jnp.exp(logits - m)
    denom = jnp.sum(e, axis=-1, keepdims=True)
    # Exact division: DMA-bound kernel, the extra VPU work is free and keeps
    # sum-to-1 within f32 eps.
    o_ref[...] = (e / denom).astype(o_ref.dtype)


def prepare_gating_params(w, b, *, compute_dtype=jnp.bfloat16):
    """Pad (w, b) to a full 128-lane expert tile ONCE, outside the step loop.

    w: (d_model, num_experts); b: (num_experts,).
    """
    d_model, num_experts = w.shape
    e_pad = _round_up(num_experts, LANES)
    w_p = jnp.zeros((d_model, e_pad), compute_dtype).at[:, :num_experts].set(
        w.astype(compute_dtype))
    b_p = jnp.full((1, e_pad), -1e30, jnp.float32).at[0, :num_experts].set(
        b.astype(jnp.float32))
    return w_p, b_p


def gating_network(x, w_p, b_p, num_experts, *, tm=None, vmem_budget_bytes=None):
    """x: (..., d_model); (w_p, b_p) from prepare_gating_params."""
    d_model, e_pad = w_p.shape
    lead = x.shape[:-1]
    assert x.shape[-1] == d_model

    out_dtype = x.dtype
    x2 = x.reshape(-1, d_model).astype(w_p.dtype)  # bf16 streaming
    n = x2.shape[0]

    # --- generation-aware VMEM budget (v7x: 64 MiB/TC, v5e/v6e: 128 MiB) ---
    big_vmem = _vmem_capacity_bytes() >= 96 * 1024 * 1024
    if vmem_budget_bytes is None:
        vmem_budget_bytes = (80 if big_vmem else 40) * 1024 * 1024
    vmem_limit_bytes = (100 if big_vmem else 48) * 1024 * 1024

    in_item = jnp.dtype(w_p.dtype).itemsize
    out_item = jnp.dtype(out_dtype).itemsize
    b_item = jnp.dtype(b_p.dtype).itemsize

    # --- pick the row tile: biggest multiple of 8 fitting the VMEM budget ---
    if tm is None:
        fixed = d_model * e_pad * in_item + e_pad * b_item        # resident w + b (1 buffer)
        per_row = 2 * (d_model * in_item + e_pad * out_item)      # double-buffered x + out
        avail = max(vmem_budget_bytes - fixed, SUBLANES * per_row)
        tm = (avail // per_row) // SUBLANES * SUBLANES
        tm = int(max(SUBLANES, min(tm, 4096)))
    tm = int(max(SUBLANES, min(tm, _round_up(n, SUBLANES))))
    tm = (tm // SUBLANES) * SUBLANES

    # --- grid sizing: no wrapper-side padding of x; Pallas masks the ragged last block ---
    grid_len = pl.cdiv(n, tm)
    # Keep >=2 steps when there is enough work so the "parallel" row axis can
    # shard across both TensorCores on megacore parts (v7x).
    if grid_len < 2 and n > SUBLANES:
        tm = max(SUBLANES, _round_up(pl.cdiv(n, 2), SUBLANES))
        grid_len = pl.cdiv(n, tm)
    # Prefer an even grid length (2 TCs on v7x -> avoid a 2:1 core imbalance).
    if grid_len > 1 and grid_len % 2 == 1:
        tm_even = max(SUBLANES, _round_up(pl.cdiv(n, grid_len + 1), SUBLANES))
        if pl.cdiv(n, tm_even) % 2 == 0:
            tm = tm_even
            grid_len = pl.cdiv(n, tm)

    cost = pl.CostEstimate(
        flops=2 * n * d_model * e_pad + 4 * n * e_pad,
        transcendentals=n * e_pad,
        bytes_accessed=(n * d_model * in_item + n * e_pad * out_item
                        + d_model * e_pad * in_item + e_pad * b_item),
    )

    out = pl.pallas_call(
        _gating_kernel,
        out_shape=jax.ShapeDtypeStruct((n, e_pad), out_dtype),
        grid_spec=pltpu.PrefetchScalarGridSpec(
            num_scalar_prefetch=0,
            grid=(grid_len,),
            in_specs=[
                pl.BlockSpec((tm, d_model), lambda i: (i, 0)),
                _resident_spec((d_model, e_pad)),
                _resident_spec((1, e_pad)),
            ],
            out_specs=pl.BlockSpec((tm, e_pad), lambda i: (i, 0)),
        ),
        compiler_params=pltpu.CompilerParams(
            dimension_semantics=("parallel",),
            vmem_limit_bytes=vmem_limit_bytes,
        ),
        cost_estimate=cost,
    )(x2, w_p, b_p)

    return out[:, :num_experts].reshape(*lead, num_experts)


if __name__ == "__main__":
    # small, deterministic setup consistent with the module
    d_model, num_experts = 32, 4
    batch, seq = 2, 8

    key = jax.random.PRNGKey(0)
    kx, kw, kb = jax.random.split(key, 3)

    # PyTorch nn.Linear default init: U(-1/sqrt(d_model), 1/sqrt(d_model))
    bound = 1.0 / (d_model ** 0.5)
    w = jax.random.uniform(kw, (d_model, num_experts), jnp.float32, -bound, bound)
    b = jax.random.uniform(kb, (num_experts,), jnp.float32, -bound, bound)

    x = jax.random.normal(kx, (batch, seq, d_model), jnp.float32)

    w_p, b_p = prepare_gating_params(w, b)       # padded once, reused across steps
    out = gating_network(x, w_p, b_p, num_experts)
    out = jax.block_until_ready(out)

    # references: exact f32, and one matching the kernel's bf16 streaming
    ref_f32 = jax.nn.softmax(jnp.einsum("bld,de->ble", x, w) + b, axis=-1)
    ref_bf16 = jax.nn.softmax(
        jnp.einsum("bld,de->ble", x.astype(jnp.bfloat16), w.astype(jnp.bfloat16),
                   preferred_element_type=jnp.float32) + b, axis=-1)

    assert out.shape == (batch, seq, num_experts)
    assert out.dtype == x.dtype
    assert jnp.allclose(out, ref_bf16, atol=1e-3), "mismatch vs bf16-input reference"
    assert jnp.allclose(out, ref_f32, atol=2e-2), "mismatch vs f32 reference"
    assert jnp.allclose(jnp.sum(out, axis=-1), 1.0, atol=1e-5)

    print("KERNEL_OK")
</pallas_src>

<mosaic_0001>
module attributes {stable_mosaic.version = 11 : i64} {
  func.func @_gating_kernel(%arg0: i32, %arg1: memref<8x32xbf16, #tpu.memory_space<vmem>>, %arg2: memref<32x128xbf16, #tpu.memory_space<vmem>>, %arg3: memref<1x128xf32, #tpu.memory_space<vmem>>, %arg4: memref<8x128xf32, #tpu.memory_space<vmem>>) attributes {dimension_semantics = [#tpu.dimension_semantics<parallel>], iteration_bounds = array<i64: 2>, scalar_prefetch = 0 : i64, scratch_operands = 0 : i64, tpu.core_type = #tpu.core_type<tc>, window_params = [{transform_indices = @transform_0, window_bounds = array<i64: 8, 32>}, {pipeline_mode = #tpu.pipeline_mode<synchronous>, transform_indices = @transform_1, window_bounds = array<i64: 32, 128>}, {pipeline_mode = #tpu.pipeline_mode<synchronous>, transform_indices = @transform_2, window_bounds = array<i64: 1, 128>}, {transform_indices = @transform_3, window_bounds = array<i64: 8, 128>}]} {
    %c0 = arith.constant 0 : index
    %c0_0 = arith.constant 0 : index
    %0 = vector.load %arg1[%c0, %c0_0] : memref<8x32xbf16, #tpu.memory_space<vmem>>, vector<8x32xbf16>
    %c0_1 = arith.constant 0 : index
    %c0_2 = arith.constant 0 : index
    %1 = vector.load %arg2[%c0_1, %c0_2] : memref<32x128xbf16, #tpu.memory_space<vmem>>, vector<32x128xbf16>
    %cst = arith.constant dense<0.000000e+00> : vector<8x128xf32>
    %2 = tpu.matmul %0, %1, %cst {dimension_numbers = #tpu.dot_dimension_numbers<[1], [0], [0], [1], [0, 0, 1, 1], [], []>} : vector<8x32xbf16>, vector<32x128xbf16>, vector<8x128xf32> -> vector<8x128xf32>
    %c0_3 = arith.constant 0 : index
    %c0_4 = arith.constant 0 : index
    %3 = vector.load %arg3[%c0_3, %c0_4] : memref<1x128xf32, #tpu.memory_space<vmem>>, vector<1x128xf32>
    %4 = vector.broadcast %3 : vector<1x128xf32> to vector<8x128xf32>
    %5 = arith.addf %2, %4 : vector<8x128xf32>
    %cst_5 = arith.constant dense<0xFF800000> : vector<8xf32>
    %6 = vector.multi_reduction <maximumf>, %5, %cst_5 [1] : vector<8x128xf32> to vector<8xf32>
    %7 = vector.shape_cast %6 : vector<8xf32> to vector<8x1xf32>
    %8 = vector.broadcast %7 : vector<8x1xf32> to vector<8x128xf32>
    %9 = arith.subf %5, %8 : vector<8x128xf32>
    %10 = math.exp %9 : vector<8x128xf32>
    %cst_6 = arith.constant dense<0.000000e+00> : vector<8xf32>
    %11 = vector.multi_reduction <add>, %10, %cst_6 [1] : vector<8x128xf32> to vector<8xf32>
    %12 = vector.shape_cast %11 : vector<8xf32> to vector<8x1xf32>
    %13 = vector.broadcast %12 : vector<8x1xf32> to vector<8x128xf32>
    %14 = arith.divf %10, %13 : vector<8x128xf32>
    %c0_7 = arith.constant 0 : index
    %c0_8 = arith.constant 0 : index
    %15 = vector.load %arg4[%c0_7, %c0_8] : memref<8x128xf32, #tpu.memory_space<vmem>>, vector<8x128xf32>
    tpu.vector_store %arg4[%c0_7, %c0_8], %14 {strides = array<i32>} : memref<8x128xf32, #tpu.memory_space<vmem>>, vector<8x128xf32>,
    return
  }
  func.func @transform_0(%arg0: i32) -> (i32, i32) {
    %c0_i32 = arith.constant 0 : i32
    %c0_i32_0 = arith.constant 0 : i32
    return %arg0, %c0_i32 : i32, i32
  }
  func.func @transform_1(%arg0: i32) -> (i32, i32) {
    %c0_i32 = arith.constant 0 : i32
    %c0_i32_0 = arith.constant 0 : i32
    %c0_i32_1 = arith.constant 0 : i32
    return %c0_i32, %c0_i32_0 : i32, i32
  }
  func.func @transform_2(%arg0: i32) -> (i32, i32) {
    %c0_i32 = arith.constant 0 : i32
    %c0_i32_0 = arith.constant 0 : i32
    %c0_i32_1 = arith.constant 0 : i32
    return %c0_i32, %c0_i32_0 : i32, i32
  }
  func.func @transform_3(%arg0: i32) -> (i32, i32) {
    %c0_i32 = arith.constant 0 : i32
    %c0_i32_0 = arith.constant 0 : i32
    return %arg0, %c0_i32 : i32, i32
  }
}

</mosaic_0001>

<bundles_post_ra>
// kernel: tpu_custom_call.1
= control target key start
LH: loop header
LB: loop body
LE: loop exit
PB: predicated region body
PF: predicated region fallthrough
CT: control target
= control target key end

     0   :  { %8 = vsyncpa [#allocation3], 0  ;;  %s779_s0 = inlined_call_operand.hbm [shape: bf16[16,32], index: 0, kind: input, shape index: {}]   ;;  %s780_s1 = inlined_call_operand.hbm [shape: bf16[32,128], index: 1, kind: input, shape index: {}]   ;;  %s781_s2 = inlined_call_operand.vmem [shape: f32[1,128], index: 2, kind: input, shape index: {}]   ;;  %s782_s3 = inlined_call_operand.hbm [shape: f32[16,128], index: 3, kind: output, shape index: {}]  }
   0x1   :  { %10 = vsyncpa [#allocation3 + $0x1], 0 }
   0x2   :  { %11 = vsyncpa [#allocation6], 0 }
   0x3   :  { %12 = vsyncpa [#allocation4], 0 }
   0x4   :  { %14 = vsyncpa [#allocation4 + $0x1], 0  ;;  %s621_s12 = smov 0   ;;  %s623_s13 = smov 0  }
   0x5   :  { %s625_s14 = smov 0   ;;  %s627_s15 = smov 0  }
   0x6 LB: > { %s642_s16 = sadd.s32 4294967295, %s592_s15   ;;  %s374_s17 = sadd.s32 4294967294, %s592_s15   ;;  %s592_s15 = sphi %s627_s15, %s804_s15   ;;  %s588_s14 = sphi %s625_s14, %s803_s14   ;;  %s584_s13 = sphi %s623_s13, %s802_s13   ;;  %s580_s12 = sphi %s621_s12, %s801_s12  }
   0x7   : > { %p40_p0 = scmp.ne.s32.totalorder %s584_s13, %s580_s12  ;;  %p783_p1 = scmp.eq.s32.totalorder %s642_s16, 0 }
   0x8   : > { %p112_p3 = scmp.eq.s32.totalorder %s374_s17, 1  ;;  %p375_p5 = scmp.ge.s32.totalorder %s592_s15, 1 }
   0x9   : > { %p651_p4 = por %p783_p1, %p40_p0  ;;  %p119_p7 = scmp.lt.s32.totalorder %s592_s15, 3 }
   0xa   : > { %p656_p6 = por %p112_p3, %p40_p0  ;;  %s594_s21 = smov [#allocation5]  }
   0xb   : > { %s787_s18 = scalar_select %p651_p4, 1, 0 }
   0xc   : > { %s788_s19 = scalar_select %p656_p6, 1, 0 }
   0xd   : > { %p661_p8 = pnand %p375_p5, %p119_p7  ;;  %s131_s22 = sshll.u32 %s594_s21, 4  ;;  %s132_s22 = int_to_ptr.vmem [resolvable:$true] %s131_s22 }
   0xe   : > { %s675_s24 = sadd.s32 1, %s592_s15   ;;  %s27_s25 = sadd.s32 1, %s588_s14 }
   0xf   : > { %s789_s20 = scalar_select %p661_p8, 1, 0 }
  0x10   : > { %p411_p9 = pneg %p661_p8  ;;  %s24_s26 = ssub.s32 %s592_s15, %s675_s24 }
  0x11   : > { %s481_s27 = scalar_lea.vmem %s132_s22, 256  ;;  %p489_p5 = scmp.lt.s32.totalorder %s132_s22, %s132_s22 }
  0x12   : > { %p670_p11 = pnand %p411_p9, %p783_p1  ;;  %p482_p13 = scmp.ne.s32.totalorder %s132_s22, %s481_s27 }
  0x13   : > { %p490_p7 = scmp.lt.s32.totalorder %s481_s27, %s481_s27 }
  0x14   : > { %p472_p12 = pneg %p670_p11 }
  0x15   : > { %p491_p10 = por %p490_p7, %p489_p5 }
  0x16   : > { %p484_p0 = pnand %p482_p13, %p472_p12 }
  0x18   : > { %p485_p3 = pneg %p484_p0 }
  0x1a   : > { %p492_p2 = pnand %p491_p10, %p485_p3 }
  0x1c   : > { %495 = shalt.err (!%p492_p2)
}
  0x1d   : > { %s595_s28 = smov 64   ;;  %s596_s29 = smov 4  }
  0x1e   : > { %414 = dma.hbm_to_vmem [thread:$0]  (!%p670_p11), %s780_s1, 256, %s132_s22, [#allocation6], %s595_s28, %s595_s28, %s596_s29  }
  0x1f   : > { %p25_p9 = scmp.eq.s32.totalorder %s24_s26, 0  ;;  %p34_p12 = scmp.ne.s32.totalorder %s588_s14, %s584_s13 }
  0x20   : > { %p35_p10 = scmp.eq.s32.totalorder %s592_s15, 0  ;;  %p424_p2 = scmp.lt.s32.totalorder %s592_s15, 2 }
  0x21   : > { %s692_s5 = scalar_select %p25_p9, %s588_s14, %s27_s25  }
  0x22   : > { %p36_p13 = por %p35_p10, %p34_p12  ;;  %p791_p0 = scmp.eq.s32.totalorder %s642_s16, 1 }
  0x23   : > { %s148_s7 = sand.u32 1, %s588_s14   ;;  %s379_s8 = sshll.u32 %s592_s15, 6 }
  0x24   : > { %p696_p3 = por %p791_p0, %p34_p12  ;;  %s378_s9 = sshll.u32 %s148_s7, 2 }
  0x25   : > { %s705_s17 = scalar_lea.hbm %s779_s0, %s379_s8  ;;  %s152_s21 = scalar_lea.vmem [#allocation2], %s378_s9 }
  0x26   : > { %s792_s6 = scalar_select %p696_p3, 1, 0 }
  0x27   : > { %s159_s22 = sshll.u32 %s152_s21, 4  ;;  %p707_p11 = pnand %p424_p2, %p36_p13  ;;  %s160_s22 = int_to_ptr.vmem [resolvable:$true] %s159_s22 }
  0x28   : > { %s149_s25 = scalar_lea.sflag [#allocation3], %s148_s7  ;;  %s496_s26 = scalar_lea.hbm %s705_s17, 64 }
  0x29   : > { %p497_p5 = scmp.ne.s32.totalorder %s705_s17, %s496_s26  ;;  %p498_p7 = pneg %p707_p11 }
  0x2a   : > { %s501_s29 = scalar_lea.hbm %s779_s0, 128  ;;  %p502_p10 = scmp.lt.s32.totalorder %s705_s17, %s779_s0 }
  0x2b   : > { %p499_p9 = pnand %p498_p7, %p497_p5  ;;  %p503_p2 = scmp.lt.s32.totalorder %s501_s29, %s496_s26 }
  0x2d   : > { %p500_p12 = pneg %p499_p9  ;;  %p504_p13 = por %p503_p2, %p502_p10 }
  0x2f   : > { %p505_p0 = pnand %p504_p13, %p500_p12 }
  0x31   : > { %508 = shalt.err (!%p505_p0)
}
  0x32   : > { %s509_s8 = scalar_lea.vmem %s160_s22, 64  ;;  %s597_s7 = smov [#allocation2]  }
  0x33   : > { %p510_p1 = scmp.ne.s32.totalorder %s160_s22, %s509_s8  ;;  %s514_s9 = sshll.u32 %s597_s7, 4  ;;  %s515_s9 = int_to_ptr.vmem [resolvable:$false] %s514_s9 }
  0x34   : > { %s516_s10 = scalar_lea.vmem %s515_s9, 128  ;;  %p517_p5 = scmp.lt.s32.totalorder %s160_s22, %s515_s9 }
  0x35   : > { %p512_p6 = pnand %p510_p1, %p498_p7  ;;  %p518_p9 = scmp.lt.s32.totalorder %s516_s10, %s509_s8 }
  0x37   : > { %p513_p3 = pneg %p512_p6  ;;  %p519_p4 = por %p518_p9, %p517_p5 }
  0x39   : > { %p520_p8 = pnand %p519_p4, %p513_p3 }
  0x3b   : > { %523 = shalt.err (!%p520_p8)
}
  0x3c   : > { %418 = dma.hbm_to_vmem [thread:$0]  (!%p707_p11), %s705_s17, 64, %s160_s22, %s149_s25  }
  0x3d   : > { %p794_p12 = scmp.ne.s32.totalorder %s789_s20, 0 }
  0x3e   : > { %s728_s11 = sand.u32 (!%p794_p12), 1, %s584_s13   ;;  %p795_p1 = scmp.ne.s32.totalorder (!%p794_p12), %s787_s18, 0 }
  0x3f   : > { %168 = sbr.rel (%p794_p12) target bundleno = 599 (0x257), region = 32  ;;  %s381_s21 = sshll.u32 (!%p794_p12), %s728_s11, 2 }
  0x40   : > { %s171_s26 = scalar_lea.sflag (!%p794_p12), [#allocation3], %s728_s11  ;;  %s174_s27 = scalar_lea.vmem (!%p794_p12), [#allocation2], %s381_s21 }
  0x44   : > { %567 = dma.done.wait (%p795_p1), %s171_s26, 64  }
  0x45   : > { %569 = vsyncadd (%p795_p1), %s171_s26, 4294967232  ;;  %p796_p4 = scmp.eq.s32.totalorder %s642_s16, 0 }
  0x47   : > { %571 = dma.done.wait (%p796_p4), [#allocation6], 256   ;;  %p797_p6 = pmov %p796_p4 }
  0x48   : > { %v598_v0 = vmov 0.0   ;;  %vm599_vm0 = vmmov 0   ;;  %v464_v1 = vld [vmem:[#allocation5 + $0x8] sm:$0xff]   ;;  %v465_v2 = vld [vmem:[#allocation5] sm:$0xff]   ;;  %v202_v3 = vld [vmem:[%s174_s27] sm:$0xf] }
  0x49   : > { %573 = vsyncadd (%p797_p6), [#allocation6], 4294967040  ;;  %395 = vmatprep.subr.bf16.mxu0 %v598_v0  ;;  %399 = vmatprep.mubr.msk.bf16.mxu0 %vm599_vm0, %v598_v0  ;;  %vm226_vm1 = vcmask 261120   ;;  %v384_v4 = vld [vmem:[%s781_s2] ss:$0 sm:$0xff]  ;;  %s383_s17 = sshll.u32 %s728_s11, 3 }
  0x4a   : > { %396 = vmatpush3.bf16.msra.mxu0 %v464_v1  ;;  %s389_s22 = sshll.u32 %s642_s16, 7  ;;  %s200_s23 = scalar_lea.vmem [#allocation7], %s383_s17 }
  0x4b   : > { %397 = vmatprep.subr.bf16.mxu0 %v598_v0  ;;  %s294_s25 = sshll.u32 %s200_s23, 4  ;;  %s292_s30 = scalar_lea.hbm %s782_s3, %s389_s22  ;;  %s295_s25 = int_to_ptr.vmem [resolvable:$true] %s294_s25 }
  0x4c   : > { %s281_s4 = scalar_lea.sflag [#allocation4], %s728_s11  ;;  %s524_s8 = scalar_lea.vmem %s295_s25, 128 }
  0x4d   : > { %p525_p8 = scmp.ne.s32.totalorder %s295_s25, %s524_s8  ;;  %p798_p3 = scmp.ne.s32.totalorder %s792_s6, 0 }
  0x4e   : > { %398 = vmatpush3.bf16.msra.mxu0 %v465_v2  ;;  %s600_s7 = smov [#allocation7]  }
  0x4f   : > { %p526_p11 = pnand %p525_p8, %p798_p3  ;;  %s528_s9 = sshll.u32 %s600_s7, 4  ;;  %s529_s9 = int_to_ptr.vmem [resolvable:$false] %s528_s9 }
  0x50   : > { %s530_s16 = scalar_lea.vmem %s529_s9, 256  ;;  %p531_p10 = scmp.lt.s32.totalorder %s295_s25, %s529_s9 }
  0x51   : > { %400 = vmatmul.mubr.msk.bf16.vlgmr.msra.gmra.mxu0 %vm226_vm1, %v202_v3  ;;  %p527_p7 = pneg %p526_p11  ;;  %p532_p2 = scmp.lt.s32.totalorder %s530_s16, %s524_s8 }
  0x53   : > { %p533_p13 = por %p532_p2, %p531_p10 }
  0x55   : > { %p534_p0 = pnand %p533_p13, %p527_p7 }
 0x111   : > { %v264_v5 = vpop.f32.mrf.mxu0 }
 0x112   : > { %v265_v6 = vadd.f32 %v384_v4, %v264_v5 }
 0x113   : > { %v401_v7 = vpop.f32.mrf.mxu0 }
 0x114   : > { %270 = vmax.xlane.f32.xlu0 %v265_v6 }
 0x115   : > { %v267_v8 = vpop.f32.mrf.mxu0 }
 0x117   : > { %v402_v9 = vpop.f32.mrf.mxu0 }
 0x19d   : > { %v271_v10 = vpop.xlane.xlu0 %270 }
 0x19e   : > { %v272_v11 = vsub.f32 %v265_v6, %v271_v10 }
 0x1a0   : > { %v273_v12 = vmul.f32 1.442695, %v272_v11 }
 0x1a2   : > { %466 = vpow2.f32 %v273_v12 }
 0x1af   : > { %v467_v13 = vpop.eup %466 }
 0x1b0   : > { %275 = vadd.xlane.f32.xlu0 %v467_v13 }
 0x239   : > { %v276_v14 = vpop.xlane.xlu0 %275 }
 0x23a   : > { %468 = vrcp.f32 %v276_v14 }
 0x247   : > { %v469_v15 = vpop.eup %468 }
 0x248   : > { %v278_v16 = vmul.f32 %v469_v15, %v467_v13 }
 0x24a   : > { %279 = vst [vmem:[%s200_s23] sm:$0xff] %v278_v16 }
 0x24b   : > { %537 = shalt.err (!%p534_p0)
}
 0x24c   : > { %s538_s10 = scalar_lea.hbm %s292_s30, 128  ;;  %s542_s26 = scalar_lea.hbm %s782_s3, 256 }
 0x24d   : > { %p539_p5 = scmp.ne.s32.totalorder %s292_s30, %s538_s10  ;;  %p543_p1 = scmp.lt.s32.totalorder %s292_s30, %s782_s3 }
 0x24e   : > { %p544_p4 = scmp.lt.s32.totalorder %s542_s26, %s538_s10 }
 0x24f   : > { %p540_p9 = pnand %p539_p5, %p798_p3 }
 0x250   : > { %p545_p6 = por %p544_p4, %p543_p1 }
 0x251   : > { %p541_p12 = pneg %p540_p9 }
 0x253   : > { %p546_p8 = pnand %p545_p6, %p541_p12 }
 0x255   : > { %549 = shalt.err (!%p546_p8)
}
 0x256   : > { %409 = dma.vmem_to_hbm [thread:$0]  (%p798_p3), %s295_s25, 128, %s292_s30, %s281_s4  }
 0x257 PF: > { %s306_s20 = sand.u32 1, %s580_s12   ;;  %p799_p11 = scmp.ne.s32.totalorder %s788_s19, 0 }
 0x258   : > { %p800_p7 = scmp.ge.s32.totalorder %s592_s15, 2  ;;  %s307_s17 = scalar_lea.sflag [#allocation4], %s306_s20 }
 0x25a   : > { %p420_p10 = pnand %p800_p7, %p799_p11 }
 0x25c   : > { %p421_p2 = pneg %p420_p10 }
 0x25e   : > { %575 = dma.done.wait (%p421_p2), %s307_s17, 128  }
 0x25f   : > { %577 = vsyncadd (%p421_p2), %s307_s17, 4294967168  ;;  %p17_p13 = scmp.ge.s32.totalorder %s675_s24, 4   ;;  %s801_s12 = smov %s584_s13 }
 0x260   : > { %s802_s13 = smov %s588_s14  ;;  %s803_s14 = smov %s692_s5 }
 0x261   : > { %s804_s15 = smov %s675_s24  ;;  %19 = sbr.rel (!%p17_p13) target bundleno = 6 (0x6), region = 81 }
 0x266   :  { %312 = vsyncpa [#allocation3], 1 }
 0x267   :  { %314 = vsyncpa [#allocation3 + $0x1], 1 }
 0x268   :  { %315 = vsyncpa [#allocation6], 1 }
 0x269   :  { %316 = vsyncpa [#allocation4], 1 }
 0x26a   :  { %318 = vsyncpa [#allocation4 + $0x1], 1 }

</bundles_post_ra>
